<compile_context>
chip_gen: v6e
topology: v6e:2x2x1
jax: 0.10.0
libtpu: 0.0.40
codegen_flags: <defaults>
</compile_context>

<pallas_src>
import math
import numpy as np

import jax
import jax.numpy as jnp
from jax.experimental import pallas as pl
from jax.experimental.pallas import tpu as pltpu


def _segment_embed(tt_col, seg_ref, rows):
    """Vectorized segment-embedding lookup for a (rows, 1) int32 column -> (rows, D) f32."""
    T = seg_ref.shape[0]
    if T == 2:
        # Single VPU select over the whole tile.
        return jnp.where(tt_col == 0,
                         seg_ref[0:1, :].astype(jnp.float32),
                         seg_ref[1:2, :].astype(jnp.float32))
    one_hot = (jax.lax.broadcasted_iota(jnp.int32, (rows, T), 1) == tt_col)
    return jnp.dot(one_hot.astype(seg_ref.dtype), seg_ref[...],
                   preferred_element_type=jnp.float32)


# -----------------------------------------------------------------------------
# Path A: small vocab -> token table resident in VMEM, one-hot MXU gather.
# -----------------------------------------------------------------------------
def embedding_resident_kernel(idx_ref, tok_ref, seg_ref, pe_ref, out_ref):
    """One grid step = one batch row.

    idx_ref : (1, S, 2) int32; [..., 0] = input_ids, [..., 1] = token_type_ids
    tok_ref : (V, D) token table (VMEM resident)
    seg_ref : (T, D) segment table
    pe_ref  : (S, D) positional table
    out_ref : (1, S, D) output block
    """
    S, D = pe_ref.shape
    V = tok_ref.shape[0]

    idx = idx_ref[0]                    # (S, 2)
    ids = idx[:, 0:1]                   # (S, 1)
    tt = idx[:, 1:2]                    # (S, 1)

    # Token lookup as a one-hot (S, V) x (V, D) MXU matmul (exact: single 1.0 per row).
    one_hot = (jax.lax.broadcasted_iota(jnp.int32, (S, V), 1) == ids)
    tok = jnp.dot(one_hot.astype(tok_ref.dtype), tok_ref[...],
                  preferred_element_type=jnp.float32)

    seg = _segment_embed(tt, seg_ref, S)
    out_ref[0] = (tok + pe_ref[...].astype(jnp.float32) + seg).astype(out_ref.dtype)
    # TODO(synk): nn.Dropout is identity in eval mode; training-mode stochastic
    # masking/scaling (pltpu.prng_*) is intentionally not implemented here.


# -----------------------------------------------------------------------------
# Path B: large vocab -> token table in HBM, chunked double-buffered DMA gather.
# -----------------------------------------------------------------------------
def _make_gather_kernel(S, CHUNK):
    n_chunks = S // CHUNK

    def kernel(ids_ref, tt_ref, seg_ref, pe_ref, tok_hbm_ref, out_ref,
               tok_buf, sems):
        """ids_ref : (B, S) int32 in SMEM (scalar prefetch -> DMA addresses)
        tt_ref     : (1, S, 1) int32 VMEM block (vectorized segment select)
        seg_ref    : (T, D) segment table (VMEM)
        pe_ref     : (S, D) positional table (VMEM)
        tok_hbm_ref: (V, D) token table left in HBM
        out_ref    : (1, S, D) output block
        tok_buf    : (2, CHUNK, D) VMEM double-buffered gather chunks
        sems       : (2, CHUNK) DMA semaphore ring
        """
        b = pl.program_id(0)
        V = tok_hbm_ref.shape[0]

        def row_copy(s, slot, r):
            # Clamp so we never form an OOB HBM src address (no-op for valid ids;
            # note torch.nn.Embedding would raise on OOB instead).
            tok_id = jnp.clip(ids_ref[b, s], 0, V - 1)
            return pltpu.make_async_copy(
                tok_hbm_ref.at[pl.ds(tok_id, 1), :],
                tok_buf.at[slot, pl.ds(r, 1), :],
                sems.at[slot, r])

        def issue_chunk(c, slot):
            base = c * CHUNK
            for r in range(CHUNK):                  # static, small unroll
                s = jnp.minimum(base + r, S - 1)    # guards the never-taken tail prefetch
                row_copy(s, slot, r).start()

        def wait_chunk(c, slot):
            base = c * CHUNK
            for r in range(CHUNK):
                s = jnp.minimum(base + r, S - 1)
                row_copy(s, slot, r).wait()         # same logical descriptor as .start()

        # Prime slot 0, then per chunk: prefetch next -> wait current -> compute/store.
        issue_chunk(0, 0)

        @pl.loop(0, n_chunks)
        def _(c):
            slot = c & 1

            @pl.when(c + 1 < n_chunks)
            def _():
                issue_chunk(c + 1, 1 - slot)

            wait_chunk(c, slot)

            off = pl.multiple_of(c * CHUNK, CHUNK)
            tok = tok_buf[slot].astype(jnp.float32)              # (CHUNK, D)
            tt = tt_ref[0, pl.ds(off, CHUNK), :]                 # (CHUNK, 1)
            seg = _segment_embed(tt, seg_ref, CHUNK)
            pe = pe_ref[pl.ds(off, CHUNK), :].astype(jnp.float32)
            out_ref[0, pl.ds(off, CHUNK), :] = (tok + pe + seg).astype(out_ref.dtype)

    return kernel


def make_positional_table(d_model, seq_len):
    # Reproduces the (non-standard) PositionalEmbedding init from the PyTorch module.
    pe = np.zeros((seq_len, d_model), dtype=np.float32)
    for pos in range(seq_len):
        for i in range(0, d_model, 2):
            pe[pos, i] = math.sin(pos / 10000 ** (2 * i / d_model))
            if i + 1 < d_model:
                pe[pos, i + 1] = math.cos(pos / 10000 ** (2 * (i + 1) / d_model))
    return jnp.asarray(pe)


def bert_embedding(input_ids, token_type_ids, tok_table, seg_table, pe, *,
                   resident_table_budget_bytes=8 * 1024 * 1024,
                   gather_chunk=8, force_gather=False):
    B, S = input_ids.shape
    V, D = tok_table.shape
    T = seg_table.shape[0]
    assert pe.shape == (S, D)

    if token_type_ids is None:
        token_type_ids = jnp.zeros_like(input_ids)
    ids = input_ids.astype(jnp.int32)
    tt = token_type_ids.astype(jnp.int32)

    out_shape = jax.ShapeDtypeStruct((B, S, D), jnp.float32)
    cparams = pltpu.CompilerParams(dimension_semantics=("parallel",))

    tok_bytes = int(V) * int(D) * tok_table.dtype.itemsize
    use_resident = (not force_gather) and tok_bytes <= resident_table_budget_bytes

    if use_resident:
        # ids + token_type_ids packed into one (B, S, 2) int32 VMEM operand.
        idx = jnp.stack([ids, tt], axis=-1)
        grid_spec = pltpu.PrefetchScalarGridSpec(
            num_scalar_prefetch=0,
            grid=(B,),
            in_specs=[
                pl.BlockSpec((1, S, 2), lambda b: (b, 0, 0)),   # ids + token_type_ids
                pl.BlockSpec((V, D), lambda b: (0, 0)),         # token table (resident)
                pl.BlockSpec((T, D), lambda b: (0, 0)),         # segment table
                pl.BlockSpec((S, D), lambda b: (0, 0)),         # positional table
            ],
            out_specs=pl.BlockSpec((1, S, D), lambda b: (b, 0, 0)),
        )
        return pl.pallas_call(
            embedding_resident_kernel,
            out_shape=out_shape,
            grid_spec=grid_spec,
            compiler_params=cparams,
        )(idx, tok_table, seg_table, pe)

    # Large vocab: token table stays in HBM; chunked, double-buffered DMA row gather.
    chunk = gather_chunk if (gather_chunk > 0 and S % gather_chunk == 0) else S
    tt_3d = tt.reshape(B, S, 1)
    grid_spec = pltpu.PrefetchScalarGridSpec(
        num_scalar_prefetch=1,                    # input_ids -> SMEM gather addresses
        grid=(B,),
        in_specs=[
            pl.BlockSpec((1, S, 1), lambda b, ids_ref: (b, 0, 0)),   # token_type_ids
            pl.BlockSpec((T, D), lambda b, ids_ref: (0, 0)),         # segment table
            pl.BlockSpec((S, D), lambda b, ids_ref: (0, 0)),         # positional table
            pl.BlockSpec(memory_space=pl.ANY),                       # token table in HBM
        ],
        out_specs=pl.BlockSpec((1, S, D), lambda b, ids_ref: (b, 0, 0)),
        scratch_shapes=[
            pltpu.VMEM((2, chunk, D), tok_table.dtype),   # double-buffered gather chunks
            pltpu.SemaphoreType.DMA((2, chunk)),          # small semaphore ring
        ],
    )
    return pl.pallas_call(
        _make_gather_kernel(S, chunk),
        out_shape=out_shape,
        grid_spec=grid_spec,
        compiler_params=cparams,
    )(ids, tt_3d, seg_table, pe, tok_table)


if __name__ == "__main__":
    # Small shapes consistent with the module: vocab=64, d_model=32, seq_len=8,
    # type_vocab_size=2, batch=2.
    B, S, D = 2, 8, 32
    V, T = 64, 2

    key = jax.random.PRNGKey(0)
    k_tok, k_seg, k_ids, k_tt = jax.random.split(key, 4)

    # Deterministic parameter init (nn.Embedding default is N(0, 1)).
    tok_table = jax.random.normal(k_tok, (V, D), dtype=jnp.float32)
    seg_table = jax.random.normal(k_seg, (T, D), dtype=jnp.float32)
    pe = make_positional_table(D, S)

    input_ids = jax.random.randint(k_ids, (B, S), 0, V, dtype=jnp.int32)
    token_type_ids = jax.random.randint(k_tt, (B, S), 0, T, dtype=jnp.int32)

    # Pure-JAX reference.
    ref = tok_table[input_ids] + pe[None, :, :] + seg_table[token_type_ids]

    # Path A: resident-table one-hot MXU gather (default at these shapes).
    out_res = jax.block_until_ready(
        bert_embedding(input_ids, token_type_ids, tok_table, seg_table, pe))
    assert out_res.shape == (B, S, D) and out_res.dtype == jnp.float32
    assert jnp.allclose(out_res, ref, atol=1e-5), "resident-path mismatch vs reference"

    # Path B: HBM token table + chunked double-buffered DMA gather (large-vocab path,
    # forced here so it is exercised too).
    out_gth = jax.block_until_ready(
        bert_embedding(input_ids, token_type_ids, tok_table, seg_table, pe,
                       force_gather=True))
    assert out_gth.shape == (B, S, D) and out_gth.dtype == jnp.float32
    assert jnp.allclose(out_gth, ref, atol=1e-5), "gather-path mismatch vs reference"

    print("KERNEL_OK")
</pallas_src>

<mosaic_0001>
module attributes {stable_mosaic.version = 11 : i64} {
  func.func @embedding_resident_kernel(%arg0: i32, %arg1: memref<1x8x2xi32, #tpu.memory_space<vmem>>, %arg2: memref<64x32xf32, #tpu.memory_space<vmem>>, %arg3: memref<2x32xf32, #tpu.memory_space<vmem>>, %arg4: memref<8x32xf32, #tpu.memory_space<vmem>>, %arg5: memref<1x8x32xf32, #tpu.memory_space<vmem>>) attributes {dimension_semantics = [#tpu.dimension_semantics<parallel>], iteration_bounds = array<i64: 2>, scalar_prefetch = 0 : i64, scratch_operands = 0 : i64, tpu.core_type = #tpu.core_type<tc>, window_params = [{transform_indices = @transform_0, window_bounds = array<i64: 1, 8, 2>}, {pipeline_mode = #tpu.pipeline_mode<synchronous>, transform_indices = @transform_1, window_bounds = array<i64: 64, 32>}, {pipeline_mode = #tpu.pipeline_mode<synchronous>, transform_indices = @transform_2, window_bounds = array<i64: 2, 32>}, {pipeline_mode = #tpu.pipeline_mode<synchronous>, transform_indices = @transform_3, window_bounds = array<i64: 8, 32>}, {transform_indices = @transform_4, window_bounds = array<i64: 1, 8, 32>}]} {
    %c0 = arith.constant 0 : index
    %c0_0 = arith.constant 0 : index
    %c0_1 = arith.constant 0 : index
    %0 = vector.load %arg1[%c0, %c0_0, %c0_1] : memref<1x8x2xi32, #tpu.memory_space<vmem>>, vector<1x8x2xi32>
    %1 = vector.shape_cast %0 : vector<1x8x2xi32> to vector<8x2xi32>
    %2 = vector.extract_strided_slice %1 {offsets = [0, 0], sizes = [8, 1], strides = [1, 1]} : vector<8x2xi32> to vector<8x1xi32>
    %3 = vector.extract_strided_slice %1 {offsets = [0, 1], sizes = [8, 1], strides = [1, 1]} : vector<8x2xi32> to vector<8x1xi32>
    %4 = tpu.iota {dimensions = array<i32: 1>} : vector<8x64xi32>
    %5 = vector.broadcast %2 : vector<8x1xi32> to vector<8x64xi32>
    %6 = arith.cmpi eq, %4, %5 : vector<8x64xi32>
    %7 = arith.extui %6 : vector<8x64xi1> to vector<8x64xi32>
    %8 = arith.sitofp %7 : vector<8x64xi32> to vector<8x64xf32>
    %c0_2 = arith.constant 0 : index
    %c0_3 = arith.constant 0 : index
    %9 = vector.load %arg2[%c0_2, %c0_3] : memref<64x32xf32, #tpu.memory_space<vmem>>, vector<64x32xf32>
    %cst = arith.constant dense<0.000000e+00> : vector<8x32xf32>
    %10 = tpu.matmul %8, %9, %cst {dimension_numbers = #tpu.dot_dimension_numbers<[1], [0], [0], [1], [0, 0, 1, 1], [], []>} : vector<8x64xf32>, vector<64x32xf32>, vector<8x32xf32> -> vector<8x32xf32>
    %c0_i32 = arith.constant 0 : i32
    %11 = vector.broadcast %c0_i32 : i32 to vector<8x1xi32>
    %12 = arith.cmpi eq, %3, %11 : vector<8x1xi32>
    %c0_4 = arith.constant 0 : index
    %c0_5 = arith.constant 0 : index
    %13 = vector.load %arg3[%c0_4, %c0_5] : memref<2x32xf32, #tpu.memory_space<vmem>>, vector<1x32xf32>
    %c1 = arith.constant 1 : index
    %c0_6 = arith.constant 0 : index
    %14 = vector.load %arg3[%c1, %c0_6] : memref<2x32xf32, #tpu.memory_space<vmem>>, vector<1x32xf32>
    %15 = vector.shape_cast %12 : vector<8x1xi1> to vector<8x1xi1>
    %16 = vector.broadcast %15 : vector<8x1xi1> to vector<8x32xi1>
    %17 = vector.shape_cast %13 : vector<1x32xf32> to vector<1x32xf32>
    %18 = vector.broadcast %17 : vector<1x32xf32> to vector<8x32xf32>
    %19 = vector.shape_cast %14 : vector<1x32xf32> to vector<1x32xf32>
    %20 = vector.broadcast %19 : vector<1x32xf32> to vector<8x32xf32>
    %21 = arith.select %16, %18, %20 : vector<8x32xi1>, vector<8x32xf32>
    %c0_7 = arith.constant 0 : index
    %c0_8 = arith.constant 0 : index
    %22 = vector.load %arg4[%c0_7, %c0_8] : memref<8x32xf32, #tpu.memory_space<vmem>>, vector<8x32xf32>
    %23 = arith.addf %10, %22 : vector<8x32xf32>
    %24 = arith.addf %23, %21 : vector<8x32xf32>
    %c0_9 = arith.constant 0 : index
    %c0_10 = arith.constant 0 : index
    %c0_11 = arith.constant 0 : index
    %25 = vector.load %arg5[%c0_9, %c0_10, %c0_11] : memref<1x8x32xf32, #tpu.memory_space<vmem>>, vector<1x8x32xf32>
    %26 = vector.shape_cast %25 : vector<1x8x32xf32> to vector<8x32xf32>
    %27 = vector.shape_cast %24 : vector<8x32xf32> to vector<1x8x32xf32>
    tpu.vector_store %arg5[%c0_9, %c0_10, %c0_11], %27 {strides = array<i32>} : memref<1x8x32xf32, #tpu.memory_space<vmem>>, vector<1x8x32xf32>,
    return
  }
  func.func @transform_0(%arg0: i32) -> (i32, i32, i32) {
    %c0_i32 = arith.constant 0 : i32
    %c0_i32_0 = arith.constant 0 : i32
    %c0_i32_1 = arith.constant 0 : i32
    return %arg0, %c0_i32, %c0_i32_0 : i32, i32, i32
  }
  func.func @transform_1(%arg0: i32) -> (i32, i32) {
    %c0_i32 = arith.constant 0 : i32
    %c0_i32_0 = arith.constant 0 : i32
    %c0_i32_1 = arith.constant 0 : i32
    return %c0_i32, %c0_i32_0 : i32, i32
  }
  func.func @transform_2(%arg0: i32) -> (i32, i32) {
    %c0_i32 = arith.constant 0 : i32
    %c0_i32_0 = arith.constant 0 : i32
    %c0_i32_1 = arith.constant 0 : i32
    return %c0_i32, %c0_i32_0 : i32, i32
  }
  func.func @transform_3(%arg0: i32) -> (i32, i32) {
    %c0_i32 = arith.constant 0 : i32
    %c0_i32_0 = arith.constant 0 : i32
    %c0_i32_1 = arith.constant 0 : i32
    return %c0_i32, %c0_i32_0 : i32, i32
  }
  func.func @transform_4(%arg0: i32) -> (i32, i32, i32) {
    %c0_i32 = arith.constant 0 : i32
    %c0_i32_0 = arith.constant 0 : i32
    %c0_i32_1 = arith.constant 0 : i32
    return %arg0, %c0_i32, %c0_i32_0 : i32, i32, i32
  }
}

</mosaic_0001>

<bundles_post_ra>
// kernel: tpu_custom_call.1
= control target key start
LH: loop header
LB: loop body
LE: loop exit
PB: predicated region body
PF: predicated region fallthrough
CT: control target
= control target key end

     0   :  { %9 = vsyncpa [#allocation3], 0  ;;  %s677_s0 = inlined_call_operand.vmem [shape: s32[2,8,2], index: 0, kind: input, shape index: {}]   ;;  %s678_s1 = inlined_call_operand.vmem [shape: f32[64,32], index: 1, kind: input, shape index: {}]   ;;  %s679_s2 = inlined_call_operand.vmem [shape: f32[2,32], index: 2, kind: input, shape index: {}]   ;;  %s680_s3 = inlined_call_operand.vmem [shape: f32[8,32], index: 3, kind: input, shape index: {}]   ;;  %s681_s4 = inlined_call_operand.hbm [shape: f32[2,8,32], index: 4, kind: output, shape index: {}]  }
   0x1   :  { %11 = vsyncpa [#allocation3 + $0x1], 0  ;;  %s557_s15 = smov 0   ;;  %s559_s16 = smov 0  }
   0x2   :  { %s561_s17 = smov 0   ;;  %s563_s18 = smov 0  }
   0x3 LB: > { %s578_s19 = sadd.s32 4294967295, %s525_s18   ;;  %s378_s20 = sadd.s32 4294967294, %s525_s18   ;;  %s525_s18 = sphi %s563_s18, %s687_s18   ;;  %s521_s17 = sphi %s561_s17, %s686_s17   ;;  %s517_s16 = sphi %s559_s16, %s685_s16   ;;  %s513_s15 = sphi %s557_s15, %s684_s15  }
   0x4   : > { %s582_s21 = sadd.s32 1, %s525_s18   ;;  %s113_s22 = sadd.s32 1, %s521_s17 }
   0x5   : > { %s110_s23 = ssub.s32 %s525_s18, %s582_s21  ;;  %p123_p0 = scmp.ne.s32.totalorder %s521_s17, %s517_s16 }
   0x6   : > { %p111_p1 = scmp.eq.s32.totalorder %s110_s23, 0  ;;  %p124_p2 = scmp.eq.s32.totalorder %s578_s19, 1 }
   0x7   : > { %p129_p3 = scmp.ne.s32.totalorder %s517_s16, %s513_s15  ;;  %p130_p4 = scmp.eq.s32.totalorder %s378_s20, 1 }
   0x8   : > { %s593_s24 = scalar_select %p111_p1, %s521_s17, %s113_s22  }
   0x9   : > { %p595_p5 = por %p124_p2, %p123_p0  ;;  %p599_p6 = por %p130_p4, %p129_p3 }
   0xa   : > { %p381_p7 = scmp.ge.s32.totalorder %s525_s18, 1  ;;  %p164_p8 = scmp.lt.s32.totalorder %s525_s18, 3 }
   0xc   : > { %p165_p9 = pnand %p381_p7, %p164_p8 }
   0xd   : > { %p189_p10 = scmp.lt.s32.totalorder (!%p165_p9), %s578_s19, 1  ;;  %s389_s13 = sshll.u32 (!%p165_p9), %s578_s19, 7 }
   0xe   : > { %168 = sbr.rel (%p165_p9) target bundleno = 360 (0x168), region = 36  ;;  %s317_s27 = scalar_lea.hbm (!%p165_p9), %s681_s4, %s389_s13 }
   0xf   : > { %s531_s30 = smov (!%p165_p9), [#allocation2]  }
  0x13   : > { %v209_v0 = vld [vmem:[%s678_s1 + $0x38] sm:$0xff]  ;;  %v527_v1 = vmov 0   ;;  %v528_v2 = vmov 0.0   ;;  %v208_v3 = vld [vmem:[%s678_s1 + $0x30] sm:$0xff]  ;;  %s190_s5 = scalar_select %p189_p10, %s578_s19, 1  ;;  %v207_v4 = vld [vmem:[%s678_s1 + $0x28] sm:$0xff]  ;;  %v194_v13 = vlaneseq }
  0x14   : > { %463 = vset.pattern.permute.xlu0 %v527_v1  ;;  %401 = vmatprep.subr.mxu0 %v528_v2  ;;  %vm529_vm0 = vmmov 0   ;;  %v206_v5 = vld [vmem:[%s678_s1 + $0x20] sm:$0xff]  ;;  %v205_v7 = vld [vmem:[%s678_s1 + $0x18] sm:$0xff]  ;;  %v204_v8 = vld [vmem:[%s678_s1 + $0x10] sm:$0xff]  ;;  %v530_v11 = vmov 1   ;;  %vm228_vm2 = vcmask 523264  }
  0x15   : > { %402 = vmatpush3.msra.mxu0 %v209_v0  ;;  %s383_s8 = sshll.u32 %s190_s5, 3  ;;  %417 = vmatprep.mubr.msk.f32.mxu0 %vm529_vm0, %v528_v2  ;;  %v203_v10 = vld [vmem:[%s678_s1 + $0x8] sm:$0xff]  ;;  %v202_v12 = vld [vmem:[%s678_s1] sm:$0xff]  ;;  %v195_v14 = vand.u32 127, %v194_v13  ;;  %s186_s5 = sand.u32 1, %s517_s16   ;;  %vm303_vm5 = vcmask 261120  }
  0x16   : > { %403 = vmatprep.subr.mxu0 %v528_v2  ;;  %s192_s11 = scalar_lea.vmem %s677_s0, %s383_s8  ;;  %s382_s6 = sshll.u32 %s186_s5, 3  ;;  %v385_v18 = vld [vmem:[%s679_s2] ss:$0 sm:$0xff]  ;;  %v386_v19 = vld [vmem:[%s679_s2 + $0x1] ss:$0 sm:$0xff] }
  0x17   : > { %404 = vmatpush3.msra.mxu0 %v208_v3  ;;  %v193_v6 = vld [vmem:[%s192_s11] sm:$0xff]  ;;  %s188_s14 = scalar_lea.vmem [#allocation2], %s382_s6  ;;  %s306_s28 = scalar_lea.sflag [#allocation3], %s186_s5 }
  0x18   : > { %405 = vmatprep.subr.mxu0 %v528_v2  ;;  %197 = vperm.xlu0 %463, %v193_v6   ;;  %vm210_vm1 = vcmp.eq.s32.totalorder %v193_v6, 0  ;;  %v227_v20 = vld [vmem:[%s680_s3] sm:$0xff]  ;;  %s319_s20 = sshll.u32 %s188_s14, 4  ;;  %s469_s19 = sshll.u32 %s531_s30, 4  ;;  %s320_s20 = int_to_ptr.vmem [resolvable:$true] %s319_s20  ;;  %s470_s19 = int_to_ptr.vmem [resolvable:$false] %s469_s19 }
  0x19   : > { %406 = vmatpush3.msra.mxu0 %v207_v4  ;;  %v213_v9 = vsel %vm210_vm1, 1, %v527_v1  ;;  %s465_s29 = scalar_lea.vmem %s320_s20, 128  ;;  %s471_s6 = scalar_lea.vmem %s470_s19, 256 }
  0x1a   : > { %407 = vmatprep.subr.mxu0 %v528_v2  ;;  %p466_p11 = scmp.ne.s32.totalorder %s320_s20, %s465_s29  ;;  %p472_p0 = scmp.lt.s32.totalorder %s320_s20, %s470_s19 }
  0x1b   : > { %408 = vmatpush3.msra.mxu0 %v206_v5  ;;  %p473_p1 = scmp.lt.s32.totalorder %s471_s6, %s465_s29 }
  0x1c   : > { %409 = vmatprep.subr.mxu0 %v528_v2  ;;  %464 = vset.pattern.permute.xlu0 %v530_v11  ;;  %p467_p12 = pnand %p466_p11, %p595_p5 }
  0x1d   : > { %410 = vmatpush3.msra.mxu0 %v205_v7  ;;  %215 = vperm.xlu0 %464, %v213_v9   ;;  %p474_p2 = por %p473_p1, %p472_p0 }
  0x1e   : > { %411 = vmatprep.subr.mxu0 %v528_v2  ;;  %p468_p13 = pneg %p467_p12 }
  0x1f   : > { %412 = vmatpush3.msra.mxu0 %v204_v8 }
  0x20   : > { %413 = vmatprep.subr.mxu0 %v528_v2  ;;  %p475_p3 = pnand %p474_p2, %p468_p13 }
  0x21   : > { %414 = vmatpush3.msra.mxu0 %v203_v10 }
  0x22   : > { %415 = vmatprep.subr.mxu0 %v528_v2 }
  0x23   : > { %416 = vmatpush3.msra.mxu0 %v202_v12 }
  0x93   : > { %v198_v15 = vpop.permute.xlu0 %197 }
  0x94   : > { %vm199_vm3 = vcmp.eq.s32.totalorder %v195_v14, %v198_v15 }
  0x95   : > { %v384_v16 = vsel %vm199_vm3, 1.0, %v528_v2 }
  0x96   : > { %418 = vmatmul.mubr.msk.f32.vlgmr.msra.gmra.mxu0 %vm228_vm2, %v384_v16 }
  0x98   : > { %v216_v17 = vpop.permute.xlu0 %215 }
  0x99   : > { %vm217_vm4 = vcmp.eq.s32.totalorder %v216_v17, 1 }
  0x9a   : > { %v226_v22 = vsel %vm217_vm4, %v385_v18, %v386_v19 }
 0x156   : > { %v298_v21 = vpop.f32.mrf.mxu0 }
 0x157   : > { %v299_v23 = vadd.f32 %v298_v21, %v227_v20 }
 0x158   : > { %v419_v24 = vpop.f32.mrf.mxu0 }
 0x159   : > { %v302_v25 = vadd.f32 %v299_v23, %v226_v22 }
 0x15b   : > { %304 = vst.msk [vmem:[%s188_s14] sm:$0xff] %vm303_vm5, %v302_v25 }
 0x15c   : > { %478 = shalt.err (!%p475_p3)
}
 0x15d   : > { %s479_s7 = scalar_lea.hbm %s317_s27, 128  ;;  %s483_s9 = scalar_lea.hbm %s681_s4, 256 }
 0x15e   : > { %p480_p4 = scmp.ne.s32.totalorder %s317_s27, %s479_s7  ;;  %p484_p9 = scmp.lt.s32.totalorder %s317_s27, %s681_s4 }
 0x15f   : > { %p485_p10 = scmp.lt.s32.totalorder %s483_s9, %s479_s7 }
 0x160   : > { %p481_p7 = pnand %p480_p4, %p595_p5 }
 0x161   : > { %p486_p11 = por %p485_p10, %p484_p9 }
 0x162   : > { %p482_p8 = pneg %p481_p7 }
 0x164   : > { %p487_p12 = pnand %p486_p11, %p482_p8 }
 0x166   : > { %490 = shalt.err (!%p487_p12)
}
 0x167   : > { %420 = dma.vmem_to_hbm [thread:$0]  (%p595_p5), %s320_s20, 128, %s317_s27, %s306_s28  }
 0x168 PF: > { %p426_p13 = scmp.ge.s32.totalorder %s525_s18, 2  ;;  %s331_s12 = sand.u32 1, %s513_s15  }
 0x169   : > { %s332_s13 = scalar_lea.sflag [#allocation3], %s331_s12 }
 0x16a   : > { %p423_p0 = pnand %p426_p13, %p599_p6 }
 0x16c   : > { %p424_p1 = pneg %p423_p0 }
 0x16e   : > { %508 = dma.done.wait (%p424_p1), %s332_s13, 128  }
 0x16f   : > { %510 = vsyncadd (%p424_p1), %s332_s13, 4294967168  ;;  %p14_p2 = scmp.ge.s32.totalorder %s582_s21, 4   ;;  %s684_s15 = smov %s517_s16 }
 0x170   : > { %s685_s16 = smov %s521_s17  ;;  %s686_s17 = smov %s593_s24 }
 0x171   : > { %s687_s18 = smov %s582_s21  ;;  %16 = sbr.rel (!%p14_p2) target bundleno = 3 (0x3), region = 71 }
 0x176   :  { %337 = vsyncpa [#allocation3], 1 }
 0x177   :  { %339 = vsyncpa [#allocation3 + $0x1], 1 }

</bundles_post_ra>
